<compile_context>
chip_gen: v6e
topology: v6e:2x2x1
jax: 0.10.0
libtpu: 0.0.40
codegen_flags: <defaults>
</compile_context>

<pallas_src>
import functools

import jax
import jax.numpy as jnp
from jax import lax
from jax.experimental import pallas as pl
from jax.experimental.pallas import tpu as pltpu


_VMEM_LIMIT = 40 * 1024 * 1024    # < 64 MiB (v7x per-TC physical), fine on v5e/v6e
_TILE_BUDGET = 24 * 1024 * 1024   # tile working set (incl. double buffering)


def _round_up(x, m):
    return ((x + m - 1) // m) * m


# ---------------------------------------------------------------------------
# Kernel 1/3 and 3/3: tiled matmul + bias (QKV projection and output proj)
# ---------------------------------------------------------------------------
def _linear_kernel(x_ref, w_ref, b_ref, o_ref):
    # x_ref: (tm, K), w_ref: (K, N or tn), b_ref: (1, N or tn), o_ref: (tm, ...)
    acc = jnp.dot(x_ref[...], w_ref[...], preferred_element_type=jnp.float32)
    o_ref[...] = (acc + b_ref[...].astype(jnp.float32)).astype(o_ref.dtype)


def linear_pallas(x, w, b, *, tm_max=512, tn_max=512):
    """y = x @ w + b.   x: (M, K), w: (K, N), b: (N,) -> (M, N)."""
    M, K = x.shape
    Kw, N = w.shape
    assert Kw == K
    dtype = x.dtype
    isz = jnp.dtype(dtype).itemsize
    b2 = b.reshape(1, N)

    w_bytes = K * N * isz
    # Largest tm that keeps 2*weight + 2*(x tile + out tile) under budget.
    tm_cap = (_TILE_BUDGET - 2 * w_bytes) // max(1, 2 * (K + N) * isz)
    weight_resident = tm_cap >= min(128, M)

    if weight_resident:
        tm = min(M, tm_max, max(8, (int(tm_cap) // 8) * 8))
    else:
        tm = min(M, tm_max)
    nm = pl.cdiv(M, tm)

    if weight_resident:
        # Weight + bias fetched ONCE (constant block index); grid over M only.
        nn = 1
        grid = (nm,)
        in_specs = [
            pl.BlockSpec((tm, K), lambda i: (i, 0)),   # activation tile
            pl.BlockSpec((K, N), lambda i: (0, 0)),    # full weight, resident
            pl.BlockSpec((1, N), lambda i: (0, 0)),    # full bias, resident
        ]
        out_specs = pl.BlockSpec((tm, N), lambda i: (i, 0))
        dims = ("parallel",)
    else:
        # Fallback: tile N with a lane-dense (128-multiple) tile that nearly
        # divides N (avoids padded columns of pure waste).
        nn = pl.cdiv(N, tn_max)
        tn = min(_round_up(pl.cdiv(N, nn), 128), _round_up(N, 128))
        nn = pl.cdiv(N, tn)
        grid = (nm, nn)
        in_specs = [
            pl.BlockSpec((tm, K), lambda i, j: (i, 0)),
            pl.BlockSpec((K, tn), lambda i, j: (0, j)),
            pl.BlockSpec((1, tn), lambda i, j: (0, j)),
        ]
        out_specs = pl.BlockSpec((tm, tn), lambda i, j: (i, j))
        dims = ("parallel", "parallel")

    cost = pl.CostEstimate(
        flops=2 * M * K * N,
        transcendentals=0,
        bytes_accessed=(M * K * nn + K * N * (1 if weight_resident else nm)
                        + M * N + N) * isz,
    )

    return pl.pallas_call(
        _linear_kernel,
        out_shape=jax.ShapeDtypeStruct((M, N), dtype),
        grid_spec=pltpu.PrefetchScalarGridSpec(
            num_scalar_prefetch=0,
            grid=grid,
            in_specs=in_specs,
            out_specs=out_specs,
        ),
        compiler_params=pltpu.CompilerParams(
            dimension_semantics=dims,
            vmem_limit_bytes=_VMEM_LIMIT),
        cost_estimate=cost,
    )(x, w, b2)


# ---------------------------------------------------------------------------
# Kernel 2/3: attention.  Main path: K/V for a head-group fully resident in
# VMEM (single KV block), plain softmax.  Fallback: online-softmax KV tiling.
# ---------------------------------------------------------------------------
def _attn_kernel_single(q_ref, k_ref, v_ref, o_ref, *, scale):
    q = q_ref[0]                                          # (hb, tq, D)
    k = k_ref[0]                                          # (hb, N,  D)
    v = v_ref[0]                                          # (hb, N,  D)
    # MXU matmuls in the stored dtype, f32 accumulation; scale on f32 scores.
    s = jnp.einsum("hqd,hkd->hqk", q, k,
                   preferred_element_type=jnp.float32) * scale
    m = jnp.max(s, axis=-1, keepdims=True)
    p = jnp.exp(s - m)
    l = jnp.sum(p, axis=-1, keepdims=True)
    acc = jnp.einsum("hqk,hkd->hqd", p.astype(v.dtype), v,
                     preferred_element_type=jnp.float32)
    o_ref[0] = (acc * pl.reciprocal(l, approx=False)).astype(o_ref.dtype)


def _attn_kernel_online(q_ref, k_ref, v_ref, o_ref, m_sc, l_sc, acc_sc, *,
                        scale, kv_len, tkv, ragged):
    ki = pl.program_id(2)

    @pl.when(ki == 0)
    def _():
        m_sc[...] = jnp.full_like(m_sc, -1e30)
        l_sc[...] = jnp.zeros_like(l_sc)
        acc_sc[...] = jnp.zeros_like(acc_sc)

    q = q_ref[0]                                          # (hb, tq,  D)
    k = k_ref[0]                                          # (hb, tkv, D)
    v = v_ref[0]                                          # (hb, tkv, D)
    s = jnp.einsum("hqd,hkd->hqk", q, k,
                   preferred_element_type=jnp.float32) * scale
    if ragged:   # static: only emitted when N % tkv != 0 (ragged last block)
        col = ki * tkv + lax.broadcasted_iota(jnp.int32, s.shape, 2)
        s = jnp.where(col < kv_len, s, -1e30)
        row = ki * tkv + lax.broadcasted_iota(jnp.int32, v.shape, 1)
        v = jnp.where(row < kv_len, v, jnp.zeros_like(v))

    m_prev = m_sc[...]
    m_new = jnp.maximum(m_prev, jnp.max(s, axis=-1, keepdims=True))
    alpha = jnp.exp(m_prev - m_new)
    p = jnp.exp(s - m_new)
    l_sc[...] = alpha * l_sc[...] + jnp.sum(p, axis=-1, keepdims=True)
    acc_sc[...] = alpha * acc_sc[...] + jnp.einsum(
        "hqk,hkd->hqd", p.astype(v.dtype), v, preferred_element_type=jnp.float32)
    m_sc[...] = m_new

    @pl.when(ki == pl.num_programs(2) - 1)
    def _():
        o_ref[0] = (acc_sc[...] * pl.reciprocal(l_sc[...], approx=False)
                    ).astype(o_ref.dtype)


def multi_head_attention(q, k, v, *, scale, tq_max=256, tkv_max=512):
    """q, k, v: (B, H, N, D) -> (B, H, N, D).  softmax(q k^T * scale) v."""
    B, H, N, D = q.shape
    dtype = q.dtype
    isz = jnp.dtype(dtype).itemsize

    # Head batching: smallest divisor of H with hb*D >= 128 (lane-dense tiles,
    # amortized grid-step overhead), shrunk if K+V per group would be too big.
    hb = H
    for d in range(1, H + 1):
        if H % d == 0 and d * D >= 128:
            hb = d
            break
    while hb > 1 and 4 * hb * min(N, tkv_max) * D * isz > 8 * 1024 * 1024:
        hb = max(d for d in range(1, hb) if H % d == 0)
    hg = H // hb
    G = B * hg

    qg = q.reshape(G, hb, N, D)
    kg = k.reshape(G, hb, N, D)
    vg = v.reshape(G, hb, N, D)

    # Single-KV-block path whenever the head-group's K+V fit comfortably.
    single_kv = 2 * hb * N * D * isz <= 4 * 1024 * 1024
    kvw = N if single_kv else min(tkv_max, N)

    if N <= tq_max:
        tq = N
    else:
        tq = tq_max
        while tq > 16 and 3 * 4 * hb * tq * kvw > 6 * 1024 * 1024:
            tq //= 2
    nq = pl.cdiv(N, tq)

    if single_kv:
        kernel = functools.partial(_attn_kernel_single, scale=scale)
        grid = (G, nq)
        in_specs = [
            pl.BlockSpec((1, hb, tq, D), lambda g, qi: (g, 0, qi, 0)),
            pl.BlockSpec((1, hb, N, D), lambda g, qi: (g, 0, 0, 0)),   # resident
            pl.BlockSpec((1, hb, N, D), lambda g, qi: (g, 0, 0, 0)),   # resident
        ]
        out_specs = pl.BlockSpec((1, hb, tq, D), lambda g, qi: (g, 0, qi, 0))
        scratch = []
        dims = ("parallel", "parallel")
    else:
        tkv = min(tkv_max, N)
        nkv = pl.cdiv(N, tkv)
        ragged = (N % tkv) != 0
        kernel = functools.partial(_attn_kernel_online, scale=scale,
                                   kv_len=N, tkv=tkv, ragged=ragged)
        grid = (G, nq, nkv)
        in_specs = [
            pl.BlockSpec((1, hb, tq, D), lambda g, qi, ki: (g, 0, qi, 0)),
            pl.BlockSpec((1, hb, tkv, D), lambda g, qi, ki: (g, 0, ki, 0)),
            pl.BlockSpec((1, hb, tkv, D), lambda g, qi, ki: (g, 0, ki, 0)),
        ]
        out_specs = pl.BlockSpec((1, hb, tq, D), lambda g, qi, ki: (g, 0, qi, 0))
        scratch = [pltpu.VMEM((hb, tq, 1), jnp.float32),   # running max
                   pltpu.VMEM((hb, tq, 1), jnp.float32),   # running denom
                   pltpu.VMEM((hb, tq, D), jnp.float32)]   # output accumulator
        dims = ("parallel", "parallel", "arbitrary")

    cost = pl.CostEstimate(
        flops=4 * B * H * N * N * D,
        transcendentals=B * H * N * N,
        bytes_accessed=4 * B * H * N * D * isz,
    )

    out = pl.pallas_call(
        kernel,
        out_shape=jax.ShapeDtypeStruct((G, hb, N, D), dtype),
        grid_spec=pltpu.PrefetchScalarGridSpec(
            num_scalar_prefetch=0,
            grid=grid,
            in_specs=in_specs,
            out_specs=out_specs,
            scratch_shapes=scratch,
        ),
        compiler_params=pltpu.CompilerParams(
            dimension_semantics=dims,
            vmem_limit_bytes=_VMEM_LIMIT),
        cost_estimate=cost,
    )(qg, kg, vg)

    return out.reshape(B, H, N, D)


# ---------------------------------------------------------------------------
# Full module forward
# ---------------------------------------------------------------------------
def attention_forward(x, qkv_weight, q_bias, v_bias, proj_weight, proj_bias,
                      *, num_heads, qk_scale=None, compute_dtype=None):
    """Mirrors Attention.forward (attn_mask=None, dropout=0)."""
    # TODO(synk): attn_mask and non-zero attn/proj dropout are not implemented.
    B, N, C = x.shape
    A3 = qkv_weight.shape[0]
    A = A3 // 3
    D = A // num_heads
    scale = qk_scale if qk_scale is not None else D ** -0.5
    out_dtype = x.dtype

    # qkv bias = cat(q_bias, zeros, v_bias)  (all-zeros when qkv_bias=False)
    if q_bias is not None:
        qkv_b = jnp.concatenate([q_bias, jnp.zeros_like(v_bias), v_bias])
    else:
        qkv_b = jnp.zeros((A3,), dtype=x.dtype)

    w_qkv = qkv_weight.T       # (C, 3A)
    w_proj = proj_weight.T     # (A, C)
    if compute_dtype is not None:   # e.g. bf16 operands on v6e/v7x, f32 accumulate
        x = x.astype(compute_dtype)
        w_qkv = w_qkv.astype(compute_dtype)
        w_proj = w_proj.astype(compute_dtype)
        qkv_b = qkv_b.astype(compute_dtype)
        proj_bias = proj_bias.astype(compute_dtype)

    # 1) fused QKV projection (weight-resident tiled matmul)
    qkv = linear_pallas(x.reshape(B * N, C), w_qkv, qkv_b)          # (B*N, 3A)

    # split heads: (B, N, 3, H, D) -> (3, B, H, N, D)
    # TODO(synk): head split/merge transposes could be folded into BlockSpec
    # index maps; kept as explicit XLA transposes to keep block shapes legal.
    qkv = qkv.reshape(B, N, 3, num_heads, D)
    qkv = jnp.transpose(qkv, (2, 0, 3, 1, 4))
    q, k, v = qkv[0], qkv[1], qkv[2]

    # 2) attention (KV-resident softmax kernel, heads batched per grid step)
    o = multi_head_attention(q, k, v, scale=scale)                   # (B, H, N, D)

    # merge heads: (B, H, N, D) -> (B*N, A)
    o = jnp.transpose(o, (0, 2, 1, 3)).reshape(B * N, A)

    # 3) output projection
    out = linear_pallas(o, w_proj, proj_bias)                        # (B*N, C)
    return out.reshape(B, N, C).astype(out_dtype)


# ---------------------------------------------------------------------------
# Pure-JAX reference (mirrors the PyTorch forward, SDPA path, mask=None)
# ---------------------------------------------------------------------------
def reference_attention(x, qkv_weight, q_bias, v_bias, proj_weight, proj_bias,
                        num_heads, qk_scale=None):
    B, N, C = x.shape
    A = qkv_weight.shape[0] // 3
    D = A // num_heads
    scale = qk_scale if qk_scale is not None else D ** -0.5
    qkv = x @ qkv_weight.T
    if q_bias is not None:
        qkv = qkv + jnp.concatenate([q_bias, jnp.zeros_like(v_bias), v_bias])
    qkv = jnp.transpose(qkv.reshape(B, N, 3, num_heads, D), (2, 0, 3, 1, 4))
    q, k, v = qkv[0], qkv[1], qkv[2]
    attn = (q * scale) @ jnp.swapaxes(k, -1, -2)
    attn = jax.nn.softmax(attn, axis=-1)
    o = attn @ v
    o = jnp.swapaxes(o, 1, 2).reshape(B, N, A)
    return o @ proj_weight.T + proj_bias


if __name__ == "__main__":
    # Small shapes consistent with the module: batch=2, seq=16, dim=32,
    # num_heads=4 -> head_dim=8, all_head_dim=32, qkv_bias=True.
    B, N, C = 2, 16, 32
    num_heads = 4

    key = jax.random.PRNGKey(0)
    ks = jax.random.split(key, 6)
    x = jax.random.normal(ks[0], (B, N, C), dtype=jnp.float32)
    qkv_w = jax.random.normal(ks[1], (3 * C, C), dtype=jnp.float32) * 0.05
    q_b = jax.random.normal(ks[2], (C,), dtype=jnp.float32) * 0.02
    v_b = jax.random.normal(ks[3], (C,), dtype=jnp.float32) * 0.02
    proj_w = jax.random.normal(ks[4], (C, C), dtype=jnp.float32) * 0.05
    proj_b = jax.random.normal(ks[5], (C,), dtype=jnp.float32) * 0.02

    fn = jax.jit(functools.partial(attention_forward, num_heads=num_heads))
    out = jax.block_until_ready(fn(x, qkv_w, q_b, v_b, proj_w, proj_b))

    ref = reference_attention(x, qkv_w, q_b, v_b, proj_w, proj_b, num_heads)
    assert out.shape == (B, N, C), out.shape
    # Tolerance covers the TPU default (bf16-pass) matmul precision of the XLA
    # reference vs. the kernel's f32-accumulated MXU matmuls.
    err = float(jnp.max(jnp.abs(out - ref)))
    assert err < 3e-3, f"max abs err {err}"
    print("KERNEL_OK")
</pallas_src>

<mosaic_0001>
module attributes {stable_mosaic.version = 11 : i64} {
  func.func @_linear_kernel(%arg0: i32, %arg1: memref<32x32xf32, #tpu.memory_space<vmem>>, %arg2: memref<32x96xf32, #tpu.memory_space<vmem>>, %arg3: memref<1x96xf32, #tpu.memory_space<vmem>>, %arg4: memref<32x96xf32, #tpu.memory_space<vmem>>) attributes {dimension_semantics = [#tpu.dimension_semantics<parallel>], iteration_bounds = array<i64: 1>, scalar_prefetch = 0 : i64, scratch_operands = 0 : i64, tpu.core_type = #tpu.core_type<tc>, window_params = [{transform_indices = @transform_0, window_bounds = array<i64: 32, 32>}, {pipeline_mode = #tpu.pipeline_mode<synchronous>, transform_indices = @transform_1, window_bounds = array<i64: 32, 96>}, {pipeline_mode = #tpu.pipeline_mode<synchronous>, transform_indices = @transform_2, window_bounds = array<i64: 1, 96>}, {transform_indices = @transform_3, window_bounds = array<i64: 32, 96>}]} {
    %c0 = arith.constant 0 : index
    %c0_0 = arith.constant 0 : index
    %0 = vector.load %arg1[%c0, %c0_0] : memref<32x32xf32, #tpu.memory_space<vmem>>, vector<32x32xf32>
    %c0_1 = arith.constant 0 : index
    %c0_2 = arith.constant 0 : index
    %1 = vector.load %arg2[%c0_1, %c0_2] : memref<32x96xf32, #tpu.memory_space<vmem>>, vector<32x96xf32>
    %cst = arith.constant dense<0.000000e+00> : vector<32x96xf32>
    %2 = tpu.matmul %0, %1, %cst {dimension_numbers = #tpu.dot_dimension_numbers<[1], [0], [0], [1], [0, 0, 1, 1], [], []>} : vector<32x32xf32>, vector<32x96xf32>, vector<32x96xf32> -> vector<32x96xf32>
    %c0_3 = arith.constant 0 : index
    %c0_4 = arith.constant 0 : index
    %3 = vector.load %arg3[%c0_3, %c0_4] : memref<1x96xf32, #tpu.memory_space<vmem>>, vector<1x96xf32>
    %4 = vector.broadcast %3 : vector<1x96xf32> to vector<32x96xf32>
    %5 = arith.addf %2, %4 : vector<32x96xf32>
    %c0_5 = arith.constant 0 : index
    %c0_6 = arith.constant 0 : index
    %6 = vector.load %arg4[%c0_5, %c0_6] : memref<32x96xf32, #tpu.memory_space<vmem>>, vector<32x96xf32>
    tpu.vector_store %arg4[%c0_5, %c0_6], %5 {strides = array<i32>} : memref<32x96xf32, #tpu.memory_space<vmem>>, vector<32x96xf32>,
    return
  }
  func.func @transform_0(%arg0: i32) -> (i32, i32) {
    %c0_i32 = arith.constant 0 : i32
    %c0_i32_0 = arith.constant 0 : i32
    return %arg0, %c0_i32 : i32, i32
  }
  func.func @transform_1(%arg0: i32) -> (i32, i32) {
    %c0_i32 = arith.constant 0 : i32
    %c0_i32_0 = arith.constant 0 : i32
    %c0_i32_1 = arith.constant 0 : i32
    return %c0_i32, %c0_i32_0 : i32, i32
  }
  func.func @transform_2(%arg0: i32) -> (i32, i32) {
    %c0_i32 = arith.constant 0 : i32
    %c0_i32_0 = arith.constant 0 : i32
    %c0_i32_1 = arith.constant 0 : i32
    return %c0_i32, %c0_i32_0 : i32, i32
  }
  func.func @transform_3(%arg0: i32) -> (i32, i32) {
    %c0_i32 = arith.constant 0 : i32
    %c0_i32_0 = arith.constant 0 : i32
    return %arg0, %c0_i32 : i32, i32
  }
}

module attributes {stable_mosaic.version = 11 : i64} {
  func.func @_attn_kernel_single(%arg0: i32, %arg1: i32, %arg2: memref<1x4x16x8xf32, #tpu.memory_space<vmem>>, %arg3: memref<1x4x16x8xf32, #tpu.memory_space<vmem>>, %arg4: memref<1x4x16x8xf32, #tpu.memory_space<vmem>>, %arg5: memref<1x4x16x8xf32, #tpu.memory_space<vmem>>) attributes {dimension_semantics = [#tpu.dimension_semantics<parallel>, #tpu.dimension_semantics<parallel>], iteration_bounds = array<i64: 2, 1>, scalar_prefetch = 0 : i64, scratch_operands = 0 : i64, tpu.core_type = #tpu.core_type<tc>, window_params = [{transform_indices = @transform_0, window_bounds = array<i64: 1, 4, 16, 8>}, {transform_indices = @transform_1, window_bounds = array<i64: 1, 4, 16, 8>}, {transform_indices = @transform_2, window_bounds = array<i64: 1, 4, 16, 8>}, {transform_indices = @transform_3, window_bounds = array<i64: 1, 4, 16, 8>}]} {
    %c0 = arith.constant 0 : index
    %c0_0 = arith.constant 0 : index
    %c0_1 = arith.constant 0 : index
    %c0_2 = arith.constant 0 : index
    %0 = vector.load %arg2[%c0, %c0_0, %c0_1, %c0_2] : memref<1x4x16x8xf32, #tpu.memory_space<vmem>>, vector<1x4x16x8xf32>
    %1 = vector.shape_cast %0 : vector<1x4x16x8xf32> to vector<4x16x8xf32>
    %c0_3 = arith.constant 0 : index
    %c0_4 = arith.constant 0 : index
    %c0_5 = arith.constant 0 : index
    %c0_6 = arith.constant 0 : index
    %2 = vector.load %arg3[%c0_3, %c0_4, %c0_5, %c0_6] : memref<1x4x16x8xf32, #tpu.memory_space<vmem>>, vector<1x4x16x8xf32>
    %3 = vector.shape_cast %2 : vector<1x4x16x8xf32> to vector<4x16x8xf32>
    %c0_7 = arith.constant 0 : index
    %c0_8 = arith.constant 0 : index
    %c0_9 = arith.constant 0 : index
    %c0_10 = arith.constant 0 : index
    %4 = vector.load %arg4[%c0_7, %c0_8, %c0_9, %c0_10] : memref<1x4x16x8xf32, #tpu.memory_space<vmem>>, vector<1x4x16x8xf32>
    %5 = vector.shape_cast %4 : vector<1x4x16x8xf32> to vector<4x16x8xf32>
    "tpu.trace_start"() <{level = 10 : i32, message = "hqd,hkd->hqk"}> : () -> ()
    %cst = arith.constant dense<0.000000e+00> : vector<4x16x16xf32>
    %6 = tpu.matmul %1, %3, %cst {dimension_numbers = #tpu.dot_dimension_numbers<[2], [2], [1], [1], [0, 0, 0, 1, 1, 1], [0], [0]>} : vector<4x16x8xf32>, vector<4x16x8xf32>, vector<4x16x16xf32> -> vector<4x16x16xf32>
    "tpu.trace_stop"() : () -> ()
    %cst_11 = arith.constant 0.353553385 : f32
    %7 = vector.broadcast %cst_11 : f32 to vector<4x16x16xf32>
    %8 = arith.mulf %6, %7 : vector<4x16x16xf32>
    %cst_12 = arith.constant dense<0xFF800000> : vector<4x16xf32>
    %9 = vector.multi_reduction <maximumf>, %8, %cst_12 [2] : vector<4x16x16xf32> to vector<4x16xf32>
    %10 = vector.shape_cast %9 : vector<4x16xf32> to vector<4x16x1xf32>
    %11 = vector.broadcast %10 : vector<4x16x1xf32> to vector<4x16x16xf32>
    %12 = arith.subf %8, %11 : vector<4x16x16xf32>
    %13 = math.exp %12 : vector<4x16x16xf32>
    %cst_13 = arith.constant dense<0.000000e+00> : vector<4x16xf32>
    %14 = vector.multi_reduction <add>, %13, %cst_13 [2] : vector<4x16x16xf32> to vector<4x16xf32>
    %15 = vector.shape_cast %14 : vector<4x16xf32> to vector<4x16x1xf32>
    "tpu.trace_start"() <{level = 10 : i32, message = "hqk,hkd->hqd"}> : () -> ()
    %cst_14 = arith.constant dense<0.000000e+00> : vector<4x16x8xf32>
    %16 = tpu.matmul %13, %5, %cst_14 {dimension_numbers = #tpu.dot_dimension_numbers<[2], [1], [1], [2], [0, 0, 0, 1, 1, 2], [0], [0]>} : vector<4x16x16xf32>, vector<4x16x8xf32>, vector<4x16x8xf32> -> vector<4x16x8xf32>
    "tpu.trace_stop"() : () -> ()
    %17 = tpu.reciprocal %15 : vector<4x16x1xf32> -> vector<4x16x1xf32>
    %18 = vector.broadcast %17 : vector<4x16x1xf32> to vector<4x16x8xf32>
    %19 = arith.mulf %16, %18 : vector<4x16x8xf32>
    %c0_15 = arith.constant 0 : index
    %c0_16 = arith.constant 0 : index
    %c0_17 = arith.constant 0 : index
    %c0_18 = arith.constant 0 : index
    %20 = vector.load %arg5[%c0_15, %c0_16, %c0_17, %c0_18] : memref<1x4x16x8xf32, #tpu.memory_space<vmem>>, vector<1x4x16x8xf32>
    %21 = vector.shape_cast %20 : vector<1x4x16x8xf32> to vector<4x16x8xf32>
    %22 = vector.shape_cast %19 : vector<4x16x8xf32> to vector<1x4x16x8xf32>
    tpu.vector_store %arg5[%c0_15, %c0_16, %c0_17, %c0_18], %22 {strides = array<i32>} : memref<1x4x16x8xf32, #tpu.memory_space<vmem>>, vector<1x4x16x8xf32>,
    return
  }
  func.func @transform_0(%arg0: i32, %arg1: i32) -> (i32, i32, i32, i32) {
    %c0_i32 = arith.constant 0 : i32
    %c0_i32_0 = arith.constant 0 : i32
    %c0_i32_1 = arith.constant 0 : i32
    return %arg0, %c0_i32, %arg1, %c0_i32_0 : i32, i32, i32, i32
  }
  func.func @transform_1(%arg0: i32, %arg1: i32) -> (i32, i32, i32, i32) {
    %c0_i32 = arith.constant 0 : i32
    %c0_i32_0 = arith.constant 0 : i32
    %c0_i32_1 = arith.constant 0 : i32
    %c0_i32_2 = arith.constant 0 : i32
    return %arg0, %c0_i32, %c0_i32_0, %c0_i32_1 : i32, i32, i32, i32
  }
  func.func @transform_2(%arg0: i32, %arg1: i32) -> (i32, i32, i32, i32) {
    %c0_i32 = arith.constant 0 : i32
    %c0_i32_0 = arith.constant 0 : i32
    %c0_i32_1 = arith.constant 0 : i32
    %c0_i32_2 = arith.constant 0 : i32
    return %arg0, %c0_i32, %c0_i32_0, %c0_i32_1 : i32, i32, i32, i32
  }
  func.func @transform_3(%arg0: i32, %arg1: i32) -> (i32, i32, i32, i32) {
    %c0_i32 = arith.constant 0 : i32
    %c0_i32_0 = arith.constant 0 : i32
    %c0_i32_1 = arith.constant 0 : i32
    return %arg0, %c0_i32, %arg1, %c0_i32_0 : i32, i32, i32, i32
  }
}

module attributes {stable_mosaic.version = 11 : i64} {
  func.func @_linear_kernel(%arg0: i32, %arg1: memref<32x32xf32, #tpu.memory_space<vmem>>, %arg2: memref<32x32xf32, #tpu.memory_space<vmem>>, %arg3: memref<1x32xf32, #tpu.memory_space<vmem>>, %arg4: memref<32x32xf32, #tpu.memory_space<vmem>>) attributes {dimension_semantics = [#tpu.dimension_semantics<parallel>], iteration_bounds = array<i64: 1>, scalar_prefetch = 0 : i64, scratch_operands = 0 : i64, tpu.core_type = #tpu.core_type<tc>, window_params = [{transform_indices = @transform_0, window_bounds = array<i64: 32, 32>}, {pipeline_mode = #tpu.pipeline_mode<synchronous>, transform_indices = @transform_1, window_bounds = array<i64: 32, 32>}, {pipeline_mode = #tpu.pipeline_mode<synchronous>, transform_indices = @transform_2, window_bounds = array<i64: 1, 32>}, {transform_indices = @transform_3, window_bounds = array<i64: 32, 32>}]} {
    %c0 = arith.constant 0 : index
    %c0_0 = arith.constant 0 : index
    %0 = vector.load %arg1[%c0, %c0_0] : memref<32x32xf32, #tpu.memory_space<vmem>>, vector<32x32xf32>
    %c0_1 = arith.constant 0 : index
    %c0_2 = arith.constant 0 : index
    %1 = vector.load %arg2[%c0_1, %c0_2] : memref<32x32xf32, #tpu.memory_space<vmem>>, vector<32x32xf32>
    %cst = arith.constant dense<0.000000e+00> : vector<32x32xf32>
    %2 = tpu.matmul %0, %1, %cst {dimension_numbers = #tpu.dot_dimension_numbers<[1], [0], [0], [1], [0, 0, 1, 1], [], []>} : vector<32x32xf32>, vector<32x32xf32>, vector<32x32xf32> -> vector<32x32xf32>
    %c0_3 = arith.constant 0 : index
    %c0_4 = arith.constant 0 : index
    %3 = vector.load %arg3[%c0_3, %c0_4] : memref<1x32xf32, #tpu.memory_space<vmem>>, vector<1x32xf32>
    %4 = vector.broadcast %3 : vector<1x32xf32> to vector<32x32xf32>
    %5 = arith.addf %2, %4 : vector<32x32xf32>
    %c0_5 = arith.constant 0 : index
    %c0_6 = arith.constant 0 : index
    %6 = vector.load %arg4[%c0_5, %c0_6] : memref<32x32xf32, #tpu.memory_space<vmem>>, vector<32x32xf32>
    tpu.vector_store %arg4[%c0_5, %c0_6], %5 {strides = array<i32>} : memref<32x32xf32, #tpu.memory_space<vmem>>, vector<32x32xf32>,
    return
  }
  func.func @transform_0(%arg0: i32) -> (i32, i32) {
    %c0_i32 = arith.constant 0 : i32
    %c0_i32_0 = arith.constant 0 : i32
    return %arg0, %c0_i32 : i32, i32
  }
  func.func @transform_1(%arg0: i32) -> (i32, i32) {
    %c0_i32 = arith.constant 0 : i32
    %c0_i32_0 = arith.constant 0 : i32
    %c0_i32_1 = arith.constant 0 : i32
    return %c0_i32, %c0_i32_0 : i32, i32
  }
  func.func @transform_2(%arg0: i32) -> (i32, i32) {
    %c0_i32 = arith.constant 0 : i32
    %c0_i32_0 = arith.constant 0 : i32
    %c0_i32_1 = arith.constant 0 : i32
    return %c0_i32, %c0_i32_0 : i32, i32
  }
  func.func @transform_3(%arg0: i32) -> (i32, i32) {
    %c0_i32 = arith.constant 0 : i32
    %c0_i32_0 = arith.constant 0 : i32
    return %arg0, %c0_i32 : i32, i32
  }
}

</mosaic_0001>

<bundles_post_ra>
// kernel: attention_forward.3
= control target key start
LH: loop header
LB: loop body
LE: loop exit
PB: predicated region body
PF: predicated region fallthrough
CT: control target
= control target key end

     0   :  { %8 = vsyncpa [#allocation3], 0  ;;  %s294_s0 = inlined_call_operand.hbm [shape: f32[32,32], index: 0, kind: input, shape index: {}]   ;;  %s295_s1 = inlined_call_operand.hbm [shape: f32[32,96], index: 1, kind: input, shape index: {}]   ;;  %s296_s2 = inlined_call_operand.vmem [shape: f32[1,96], index: 2, kind: input, shape index: {}]   ;;  %s297_s3 = inlined_call_operand.vmem [shape: f32[32,96], index: 3, kind: output, shape index: {}]  }
   0x1   :  { %9 = vsyncpa [#allocation5], 0  ;;  %s249_s12 = smov [#allocation2]  }
   0x2   :  { %s15_s13 = sshll.u32 %s249_s12, 4  ;;  %s16_s13 = int_to_ptr.vmem [resolvable:$true] %s15_s13 }
   0x3   :  { %s213_s14 = scalar_lea.vmem %s16_s13, 512  ;;  %p218_p1 = scmp.lt.s32.totalorder %s16_s13, %s16_s13 }
   0x4   :  { %p214_p0 = scmp.ne.s32.totalorder %s16_s13, %s213_s14  ;;  %p219_p2 = scmp.lt.s32.totalorder %s213_s14, %s213_s14 }
   0x6   :  { %p220_p3 = por %p219_p2, %p218_p1 }
   0x8   :  { %p221_p4 = pnand %p220_p3, %p214_p0 }
   0xa   :  { %224 = shalt.err (!%p221_p4)
}
   0xb   :  { %s250_s15 = smov 128   ;;  %s251_s16 = smov 8  }
   0xc   :  { %21 = dma.hbm_to_vmem [thread:$0]  %s294_s0, 512, %s16_s13, [#allocation3], %s250_s15, %s250_s15, %s251_s16  }
   0xd   :  { %s252_s19 = smov [#allocation4]  }
   0xe   :  { %s27_s20 = sshll.u32 %s252_s19, 4  ;;  %s28_s20 = int_to_ptr.vmem [resolvable:$true] %s27_s20 }
   0xf   :  { %s233_s21 = scalar_lea.vmem %s28_s20, 512  ;;  %p238_p6 = scmp.lt.s32.totalorder %s28_s20, %s28_s20 }
  0x10   :  { %p234_p5 = scmp.ne.s32.totalorder %s28_s20, %s233_s21  ;;  %p239_p7 = scmp.lt.s32.totalorder %s233_s21, %s233_s21 }
  0x12   :  { %p240_p8 = por %p239_p7, %p238_p6 }
  0x14   :  { %p241_p9 = pnand %p240_p8, %p234_p5 }
  0x16   :  { %244 = shalt.err (!%p241_p9)
}
  0x17   :  { %33 = dma.hbm_to_vmem [thread:$0]  %s295_s1, 512, %s28_s20, [#allocation5], %s250_s15, %s250_s15, %s251_s16  }
  0x18   :  { %245 = dma.done.wait [#allocation3], 512  }
  0x19   :  { %246 = vsyncadd [#allocation3], 4294966784 }
  0x1a   :  { %247 = dma.done.wait [#allocation5], 512  }
  0x1b   :  { %248 = vsyncadd [#allocation5], 4294966784  ;;  %v49_v0 = vld [vmem:[#allocation4 + $0x18] sm:$0xff]  ;;  %v48_v1 = vld [vmem:[#allocation4 + $0x10] sm:$0xff]  ;;  %vm57_vm0 = vcmask 261120   ;;  %vm155_vm1 = vcmask 785408  }
  0x1c   :  { %179 = vmatprep.subr.mxu0 %v49_v0  ;;  %193 = vmatprep.subr.mxu1 %v49_v0  ;;  %v47_v2 = vld [vmem:[#allocation4 + $0x8] sm:$0xff]  ;;  %v46_v3 = vld [vmem:[#allocation4] sm:$0xff]  ;;  %v44_v5 = vld [vmem:[#allocation2 + $0x10] sm:$0xff] }
  0x1d   :  { %180 = vmatpush3.msra.mxu0 %v49_v0  ;;  %197 = vmatpush3.msra.mxu1 %v49_v0  ;;  %v42_v4 = vld [vmem:[#allocation2] sm:$0xff]  ;;  %v43_v6 = vld [vmem:[#allocation2 + $0x8] sm:$0xff]  ;;  %v45_v7 = vld [vmem:[#allocation2 + $0x18] sm:$0xff] }
  0x1e   :  { %181 = vmatprep.subr.mxu0 %v48_v1  ;;  %194 = vmatprep.subr.mxu1 %v48_v1  ;;  %v166_v8 = vld [vmem:[%s296_s2] ss:$0 sm:$0xff] }
  0x1f   :  { %182 = vmatpush3.msra.mxu0 %v48_v1  ;;  %198 = vmatpush3.msra.mxu1 %v48_v1 }
  0x20   :  { %183 = vmatprep.subr.mxu0 %v47_v2  ;;  %195 = vmatprep.subr.mxu1 %v47_v2 }
  0x21   :  { %184 = vmatpush3.msra.mxu0 %v47_v2  ;;  %199 = vmatpush3.msra.mxu1 %v47_v2 }
  0x22   :  { %185 = vmatprep.subr.mxu0 %v46_v3  ;;  %196 = vmatprep.subr.mxu1 %v46_v3 }
  0x23   :  { %186 = vmatpush3.msra.mxu0 %v46_v3  ;;  %200 = vmatpush3.msra.mxu1 %v46_v3 }
  0x24   :  { %187 = vmatprep.mubr.msk.f32.mxu0 %vm57_vm0, %v42_v4  ;;  %190 = vmatprep.mubr.msk.f32.mxu1 %vm57_vm0, %v44_v5 }
  0x25   :  { %188 = vmatmul.mubr.msk.f32.vlgmr.msra.gmra.mxu0 %vm57_vm0, %v43_v6  ;;  %191 = vmatmul.mubr.msk.f32.vlgmr.msra.gmra.mxu1 %vm57_vm0, %v45_v7 }
  0xe5   :  { %v189_v9 = vpop.f32.mrf.mxu0  ;;  %v192_v10 = vpop.f32.mrf.mxu1 }
  0xe6   :  { %v142_v11 = vadd.f32 %v189_v9, %v166_v8  ;;  %v152_v12 = vadd.f32 %v192_v10, %v166_v8 }
  0xe7   :  { %v136_v13 = vpop.f32.mrf.mxu0  ;;  %v146_v14 = vpop.f32.mrf.mxu1 }
  0xe8   :  { %157 = vst.msk [vmem:[%s297_s3 + $0x8] sm:$0xff] %vm155_vm1, %v142_v11  ;;  %159 = vst.msk [vmem:[%s297_s3 + $0x18] sm:$0xff] %vm155_vm1, %v152_v12  ;;  %v137_v15 = vadd.f32 %v166_v8, %v136_v13  ;;  %v147_v16 = vadd.f32 %v166_v8, %v146_v14 }
  0xea   :  { %156 = vst.msk [vmem:[%s297_s3] sm:$0xff] %vm155_vm1, %v137_v15  ;;  %158 = vst.msk [vmem:[%s297_s3 + $0x10] sm:$0xff] %vm155_vm1, %v147_v16 }
  0xeb   :  { %164 = vsyncpa [#allocation3], 1 }
  0xec   :  { %165 = vsyncpa [#allocation5], 1 }

// kernel: attention_forward.5
= control target key start
LH: loop header
LB: loop body
LE: loop exit
PB: predicated region body
PF: predicated region fallthrough
CT: control target
= control target key end

     0   :  { %s269_s0 = inlined_call_operand.vmem [shape: f32[32,32], index: 0, kind: input, shape index: {}]   ;;  %s270_s1 = inlined_call_operand.vmem [shape: f32[32,32], index: 1, kind: input, shape index: {}]   ;;  %s271_s2 = inlined_call_operand.vmem [shape: f32[1,32], index: 2, kind: input, shape index: {}]   ;;  %s272_s3 = inlined_call_operand.hbm [shape: f32[32,32], index: 3, kind: output, shape index: {}]  }
   0x1   :  { %v22_v0 = vld [vmem:[%s270_s1 + $0x18] sm:$0xff]  ;;  %v21_v1 = vld [vmem:[%s270_s1 + $0x10] sm:$0xff]  ;;  %v20_v2 = vld [vmem:[%s270_s1 + $0x8] sm:$0xff] }
   0x2   :  { %161 = vmatprep.subr.mxu0 %v22_v0  ;;  %175 = vmatprep.subr.mxu1 %v22_v0 }
   0x3   :  { %162 = vmatpush3.msra.mxu0 %v22_v0  ;;  %179 = vmatpush3.msra.mxu1 %v22_v0 }
   0x4   :  { %8 = vsyncpa [#allocation3], 0  ;;  %163 = vmatprep.subr.mxu0 %v21_v1  ;;  %176 = vmatprep.subr.mxu1 %v21_v1  ;;  %v19_v3 = vld [vmem:[%s270_s1] sm:$0xff]  ;;  %vm30_vm0 = vcmask 261120   ;;  %v17_v5 = vld [vmem:[%s269_s0 + $0x10] sm:$0xff]  ;;  %s208_s29 = smov [#allocation2]  }
   0x5   :  { %164 = vmatpush3.msra.mxu0 %v21_v1  ;;  %180 = vmatpush3.msra.mxu1 %v21_v1  ;;  %v15_v4 = vld [vmem:[%s269_s0] sm:$0xff]  ;;  %v16_v6 = vld [vmem:[%s269_s0 + $0x8] sm:$0xff]  ;;  %v18_v7 = vld [vmem:[%s269_s0 + $0x18] sm:$0xff]  ;;  %s137_s30 = sshll.u32 %s208_s29, 4  ;;  %s138_s30 = int_to_ptr.vmem [resolvable:$true] %s137_s30 }
   0x6   :  { %165 = vmatprep.subr.mxu0 %v20_v2  ;;  %177 = vmatprep.subr.mxu1 %v20_v2  ;;  %v148_v8 = vld [vmem:[%s271_s2] ss:$0 sm:$0xff]  ;;  %s186_s0 = scalar_lea.vmem %s138_s30, 512  ;;  %p191_p1 = scmp.lt.s32.totalorder %s138_s30, %s138_s30 }
   0x7   :  { %166 = vmatpush3.msra.mxu0 %v20_v2  ;;  %181 = vmatpush3.msra.mxu1 %v20_v2  ;;  %p187_p0 = scmp.ne.s32.totalorder %s138_s30, %s186_s0  ;;  %p192_p2 = scmp.lt.s32.totalorder %s186_s0, %s186_s0 }
   0x8   :  { %167 = vmatprep.subr.mxu0 %v19_v3  ;;  %178 = vmatprep.subr.mxu1 %v19_v3 }
   0x9   :  { %168 = vmatpush3.msra.mxu0 %v19_v3  ;;  %182 = vmatpush3.msra.mxu1 %v19_v3  ;;  %p193_p3 = por %p192_p2, %p191_p1 }
   0xa   :  { %169 = vmatprep.mubr.msk.f32.mxu0 %vm30_vm0, %v15_v4  ;;  %172 = vmatprep.mubr.msk.f32.mxu1 %vm30_vm0, %v17_v5 }
   0xb   :  { %170 = vmatmul.mubr.msk.f32.vlgmr.msra.gmra.mxu0 %vm30_vm0, %v16_v6  ;;  %173 = vmatmul.mubr.msk.f32.vlgmr.msra.gmra.mxu1 %vm30_vm0, %v18_v7  ;;  %p194_p4 = pnand %p193_p3, %p187_p0 }
  0xcb   :  { %v171_v9 = vpop.f32.mrf.mxu0  ;;  %v174_v10 = vpop.f32.mrf.mxu1 }
  0xcc   :  { %v115_v11 = vadd.f32 %v171_v9, %v148_v8  ;;  %v125_v12 = vadd.f32 %v174_v10, %v148_v8 }
  0xcd   :  { %v109_v13 = vpop.f32.mrf.mxu0  ;;  %v119_v14 = vpop.f32.mrf.mxu1 }
  0xce   :  { %129 = vst.msk [vmem:[#allocation2 + $0x8] sm:$0xff] %vm30_vm0, %v115_v11  ;;  %131 = vst.msk [vmem:[#allocation2 + $0x18] sm:$0xff] %vm30_vm0, %v125_v12  ;;  %v110_v15 = vadd.f32 %v148_v8, %v109_v13  ;;  %v120_v16 = vadd.f32 %v148_v8, %v119_v14 }
  0xd0   :  { %128 = vst.msk [vmem:[#allocation2] sm:$0xff] %vm30_vm0, %v110_v15  ;;  %130 = vst.msk [vmem:[#allocation2 + $0x10] sm:$0xff] %vm30_vm0, %v120_v16 }
  0xd1   :  { %197 = shalt.err (!%p194_p4)
}
  0xd2   :  { %s209_s2 = smov 128   ;;  %s210_s4 = smov 8  }
  0xd3   :  { %143 = dma.vmem_to_hbm [thread:$0]  %s138_s30, 512, %s272_s3, [#allocation3], %s209_s2, %s209_s2, %s210_s4  }
  0xd4   :  { %206 = dma.done.wait [#allocation3], 512  }
  0xd5   :  { %207 = vsyncadd [#allocation3], 4294966784 }
  0xd6   :  { %147 = vsyncpa [#allocation3], 1 }

// kernel: attention_forward.4
= control target key start
LH: loop header
LB: loop body
LE: loop exit
PB: predicated region body
PF: predicated region fallthrough
CT: control target
= control target key end

     0   :  { %s1394_s12 = smov 0   ;;  %s1396_s13 = smov 0   ;;  %s1525_s0 = inlined_call_operand.vmem [shape: f32[2,4,16,8], index: 0, kind: input, shape index: {}]   ;;  %s1526_s1 = inlined_call_operand.vmem [shape: f32[2,4,16,8], index: 1, kind: input, shape index: {}]   ;;  %s1527_s2 = inlined_call_operand.vmem [shape: f32[2,4,16,8], index: 2, kind: input, shape index: {}]   ;;  %s1528_s3 = inlined_call_operand.vmem [shape: f32[2,4,16,8], index: 3, kind: output, shape index: {}]  }
   0x1   :  { %s1398_s14 = smov 0  }
   0x2 LB: > { %s25_s15 = sadd.s32 1, %s1368_s13  ;;  %p1167_p0 = scmp.ge.s32.totalorder %s1372_s14, 1  ;;  %s1372_s14 = sphi %s1398_s14, %s13_s14   ;;  %s1368_s13 = sphi %s1396_s13, %s1530_s13   ;;  %s1364_s12 = sphi %s1394_s12, %s1529_s12  }
   0x3   : > { %p27_p1 = scmp.ge.s32.totalorder %s25_s15, 2  ;;  %p178_p2 = scmp.lt.s32.totalorder %s1372_s14, 3 }
   0x5   : > { %s1532_s15 = smov (%p27_p1, %s25_s15), 0  ;;  %p179_p3 = pnand %p1167_p0, %p178_p2 }
   0x6   : > { %p221_p4 = scmp.lt.s32.totalorder (!%p179_p3), %s1364_s12, 1 }
   0x7   : > { %182 = sbr.rel (%p179_p3) target bundleno = 589 (0x24d), region = 32 }
   0xc   : > { %s1534_s12 = smov (!%p221_p4, %s1364_s12), 1  ;;  %vm274_vm0 = vcmask 64512   ;;  %vm631_vm1 = vcmask 130048  }
   0xd   : > { %s1412_s16 = sshll.u32 %s1534_s12, 6 }
   0xe   : > { %s234_s19 = scalar_lea.vmem %s1526_s1, %s1412_s16  ;;  %s1422_s22 = scalar_lea.vmem %s1525_s0, %s1412_s16 }
   0xf   : > { %v259_v0 = vld [vmem:[%s234_s19 + $0x8] sm:$0xff]  ;;  %v261_v1 = vld [vmem:[%s234_s19 + $0x18] sm:$0xff]  ;;  %v258_v2 = vld [vmem:[%s234_s19] sm:$0xff]  ;;  %s1468_s25 = scalar_lea.vmem %s1527_s2, %s1412_s16  ;;  %s1498_s28 = scalar_lea.vmem %s1528_s3, %s1412_s16 }
  0x10   : > { %1238 = vmatprep.subr.msk.mxu0 %vm274_vm0, %v259_v0  ;;  %1245 = vmatprep.subr.msk.mxu1 %vm274_vm0, %v261_v1  ;;  %v260_v3 = vld [vmem:[%s234_s19 + $0x10] sm:$0xff]  ;;  %v250_v4 = vld [vmem:[%s1422_s22] sm:$0xff]  ;;  %v263_v6 = vld [vmem:[%s234_s19 + $0x28] sm:$0xff] }
  0x11   : > { %v252_v5 = vld [vmem:[%s1422_s22 + $0x10] sm:$0xff]  ;;  %1239 = vmatpush3.xpose.msk.msra.mxu0 %vm274_vm0, %v259_v0  ;;  %1246 = vmatpush3.xpose.msk.msra.mxu1 %vm274_vm0, %v261_v1  ;;  %v265_v7 = vld [vmem:[%s234_s19 + $0x38] sm:$0xff]  ;;  %v251_v8 = vld [vmem:[%s1422_s22 + $0x8] sm:$0xff] }
  0x12   : > { %1240 = vmatprep.subr.msk.mxu0 %vm274_vm0, %v258_v2  ;;  %1247 = vmatprep.subr.msk.mxu1 %vm274_vm0, %v260_v3  ;;  %v253_v9 = vld [vmem:[%s1422_s22 + $0x18] sm:$0xff]  ;;  %v262_v10 = vld [vmem:[%s234_s19 + $0x20] sm:$0xff]  ;;  %v264_v11 = vld [vmem:[%s234_s19 + $0x30] sm:$0xff] }
  0x13   : > { %1242 = vmatprep.mubr.msk.f32.mxu0 %vm274_vm0, %v250_v4  ;;  %1249 = vmatprep.mubr.msk.f32.mxu1 %vm274_vm0, %v252_v5  ;;  %v254_v12 = vld [vmem:[%s1422_s22 + $0x20] sm:$0xff]  ;;  %v256_v13 = vld [vmem:[%s1422_s22 + $0x30] sm:$0xff]  ;;  %v255_v14 = vld [vmem:[%s1422_s22 + $0x28] sm:$0xff] }
  0x14   : > { %v257_v15 = vld [vmem:[%s1422_s22 + $0x38] sm:$0xff]  ;;  %v267_v40 = vld [vmem:[%s1468_s25 + $0x8] sm:$0xff]  ;;  %v266_v41 = vld [vmem:[%s1468_s25] sm:$0xff] }
  0x15   : > { %1241 = vmatpush3.xpose.msk.msra.mxu0 %vm274_vm0, %v258_v2  ;;  %1248 = vmatpush3.xpose.msk.msra.mxu1 %vm274_vm0, %v260_v3  ;;  %v269_v42 = vld [vmem:[%s1468_s25 + $0x18] sm:$0xff]  ;;  %v268_v43 = vld [vmem:[%s1468_s25 + $0x10] sm:$0xff]  ;;  %v271_v44 = vld [vmem:[%s1468_s25 + $0x28] sm:$0xff] }
  0x16   : > { %1252 = vmatprep.subr.msk.mxu0 %vm274_vm0, %v263_v6  ;;  %1259 = vmatprep.subr.msk.mxu1 %vm274_vm0, %v265_v7  ;;  %v273_v45 = vld [vmem:[%s1468_s25 + $0x38] sm:$0xff] }
  0x18   : > { %1243 = vmatmul.mubr.msk.f32.vlgmr.msra.gmra.mxu0 %vm274_vm0, %v251_v8  ;;  %1250 = vmatmul.mubr.msk.f32.vlgmr.msra.gmra.mxu1 %vm274_vm0, %v253_v9 }
  0x19   : > { %1253 = vmatpush3.xpose.msk.msra.mxu0 %vm274_vm0, %v263_v6  ;;  %1260 = vmatpush3.xpose.msk.msra.mxu1 %vm274_vm0, %v265_v7 }
  0x1a   : > { %1254 = vmatprep.subr.msk.mxu0 %vm274_vm0, %v262_v10  ;;  %1261 = vmatprep.subr.msk.mxu1 %vm274_vm0, %v264_v11 }
  0x1b   : > { %1256 = vmatprep.mubr.msk.f32.mxu0 %vm274_vm0, %v254_v12  ;;  %1263 = vmatprep.mubr.msk.f32.mxu1 %vm274_vm0, %v256_v13 }
  0x1d   : > { %1255 = vmatpush3.xpose.msk.msra.mxu0 %vm274_vm0, %v262_v10  ;;  %1262 = vmatpush3.xpose.msk.msra.mxu1 %vm274_vm0, %v264_v11  ;;  %v270_v10 = vld [vmem:[%s1468_s25 + $0x20] sm:$0xff] }
  0x1e   : > { %1266 = vmatprep.subr.mxu0 %v267_v40  ;;  %1273 = vmatprep.subr.mxu1 %v269_v42 }
  0x20   : > { %1257 = vmatmul.mubr.msk.f32.vlgmr.msra.gmra.mxu0 %vm274_vm0, %v255_v14  ;;  %1264 = vmatmul.mubr.msk.f32.vlgmr.msra.gmra.mxu1 %vm274_vm0, %v257_v15  ;;  %v272_v15 = vld [vmem:[%s1468_s25 + $0x30] sm:$0xff] }
  0x21   : > { %1267 = vmatpush3.msra.mxu0 %v267_v40  ;;  %1274 = vmatpush3.msra.mxu1 %v269_v42 }
  0x22   : > { %1268 = vmatprep.subr.mxu0 %v266_v41  ;;  %1275 = vmatprep.subr.mxu1 %v268_v43 }
  0x23   : > { %1269 = vmatpush3.msra.mxu0 %v266_v41  ;;  %1276 = vmatpush3.msra.mxu1 %v268_v43 }
  0x24   : > { %1280 = vmatprep.subr.mxu0 %v271_v44  ;;  %1287 = vmatprep.subr.mxu1 %v273_v45 }
  0xd8   : > { %v1244_v16 = vpop.f32.mrf.mxu0  ;;  %v1251_v17 = vpop.f32.mrf.mxu1 }
  0xd9   : > { %v624_v18 = vmul.f32 0.35355338, %v1244_v16  ;;  %v626_v21 = vmul.f32 0.35355338, %v1251_v17 }
  0xda   : > { %v353_v19 = vpop.f32.mrf.mxu0  ;;  %v440_v20 = vpop.f32.mrf.mxu1 }
  0xdb   : > { %v623_v22 = vmul.f32 0.35355338, %v353_v19  ;;  %v635_v23 = vsel %vm631_vm1, %v624_v18, -inf  ;;  %v625_v24 = vmul.f32 0.35355338, %v440_v20  ;;  %v641_v26 = vsel %vm631_vm1, %v626_v21, -inf }
  0xdc   : > { %636 = vmax.xlane.f32.xlu1 %v635_v23 }
  0xdd   : > { %v632_v25 = vsel %vm631_vm1, %v623_v22, -inf  ;;  %v638_v29 = vsel %vm631_vm1, %v625_v24, -inf }
  0xde   : > { %633 = vmax.xlane.f32.xlu0 %v632_v25 }
  0xe0   : > { %v1265_v27 = vpop.f32.mrf.mxu1  ;;  %642 = vmax.xlane.f32.xlu1 %v641_v26  ;;  %v1258_v28 = vpop.f32.mrf.mxu0 }
  0xe1   : > { %v630_v34 = vmul.f32 0.35355338, %v1265_v27  ;;  %v628_v35 = vmul.f32 0.35355338, %v1258_v28 }
  0xe2   : > { %v614_v30 = vpop.f32.mrf.mxu1  ;;  %639 = vmax.xlane.f32.xlu0 %v638_v29  ;;  %v527_v31 = vpop.f32.mrf.mxu0 }
  0xe3   : > { %v629_v32 = vmul.f32 0.35355338, %v614_v30  ;;  %v627_v33 = vmul.f32 0.35355338, %v527_v31  ;;  %v653_v38 = vsel %vm631_vm1, %v630_v34, -inf  ;;  %v647_v39 = vsel %vm631_vm1, %v628_v35, -inf }
  0xe5   : > { %v650_v36 = vsel %vm631_vm1, %v629_v32, -inf  ;;  %v644_v37 = vsel %vm631_vm1, %v627_v33, -inf }
  0xe6   : > { %651 = vmax.xlane.f32.xlu1 %v650_v36  ;;  %645 = vmax.xlane.f32.xlu0 %v644_v37 }
  0xea   : > { %654 = vmax.xlane.f32.xlu1 %v653_v38  ;;  %648 = vmax.xlane.f32.xlu0 %v647_v39 }
 0x165   : > { %v637_v46 = vpop.xlane.xlu1 %636 }
 0x166   : > { %v657_v47 = vsub.f32 %v624_v18, %v637_v46 }
 0x167   : > { %v634_v48 = vpop.xlane.xlu0 %633 }
 0x168   : > { %v666_v49 = vmul.f32 1.442695, %v657_v47  ;;  %v656_v50 = vsub.f32 %v623_v22, %v634_v48 }
 0x169   : > { %v643_v51 = vpop.xlane.xlu1 %642 }
 0x16a   : > { %1318 = vpow2.f32 %v666_v49  ;;  %v664_v52 = vmul.f32 1.442695, %v656_v50  ;;  %v659_v53 = vsub.f32 %v626_v21, %v643_v51 }
 0x16b   : > { %v640_v54 = vpop.xlane.xlu0 %639 }
 0x16c   : > { %1320 = vpow2.f32 %v664_v52  ;;  %v670_v55 = vmul.f32 1.442695, %v659_v53  ;;  %v658_v56 = vsub.f32 %v625_v24, %v640_v54 }
 0x16e   : > { %1322 = vpow2.f32 %v670_v55  ;;  %v668_v57 = vmul.f32 1.442695, %v658_v56 }
 0x16f   : > { %v652_v58 = vpop.xlane.xlu1 %651  ;;  %v646_v59 = vpop.xlane.xlu0 %645 }
 0x170   : > { %1324 = vpow2.f32 %v668_v57  ;;  %v662_v60 = vsub.f32 %v629_v32, %v652_v58  ;;  %v660_v61 = vsub.f32 %v627_v33, %v646_v59 }
 0x172   : > { %v676_v62 = vmul.f32 1.442695, %v662_v60  ;;  %v672_v63 = vmul.f32 1.442695, %v660_v61 }
 0x173   : > { %v655_v0 = vpop.xlane.xlu1 %654  ;;  %v649_v1 = vpop.xlane.xlu0 %648 }
 0x174   : > { %1326 = vpow2.f32 %v676_v62  ;;  %v663_v2 = vsub.f32 %v630_v34, %v655_v0  ;;  %v661_v3 = vsub.f32 %v628_v35, %v649_v1 }
 0x175   : > { %1328 = vpow2.f32 %v672_v63 }
 0x176   : > { %v678_v4 = vmul.f32 1.442695, %v663_v2  ;;  %v674_v5 = vmul.f32 1.442695, %v661_v3 }
 0x177   : > { %v1319_v6 = vpop.eup %1318 }
 0x178   : > { %1330 = vpow2.f32 %v678_v4  ;;  %v683_v7 = vsel %vm631_vm1, %v1319_v6, 0.0 }
 0x179   : > { %v1321_v8 = vpop.eup %1320  ;;  %1332 = vpow2.f32 %v674_v5  ;;  %684 = vadd.xlane.f32.xlu1 %v683_v7 }
 0x17a   : > { %1270 = vmatprep.mubr.msk.f32.mxu0 %vm631_vm1, %v1321_v8  ;;  %v680_v9 = vsel %vm631_vm1, %v1321_v8, 0.0 }
 0x17b   : > { %v1323_v11 = vpop.eup %1322  ;;  %1271 = vmatmul.mubr.msk.f32.vlgmr.msra.gmra.mxu0 %vm631_vm1, %v1319_v6  ;;  %681 = vadd.xlane.f32.xlu0 %v680_v9 }
 0x17c   : > { %v689_v12 = vsel %vm631_vm1, %v1323_v11, 0.0  ;;  %1281 = vmatpush3.msra.mxu0 %v271_v44 }
 0x17d   : > { %v1325_v13 = vpop.eup %1324  ;;  %690 = vadd.xlane.f32.xlu1 %v689_v12  ;;  %1282 = vmatprep.subr.mxu0 %v270_v10 }
 0x17e   : > { %1277 = vmatprep.mubr.msk.f32.mxu1 %vm631_vm1, %v1325_v13  ;;  %v686_v14 = vsel %vm631_vm1, %v1325_v13, 0.0  ;;  %1283 = vmatpush3.msra.mxu0 %v270_v10 }
 0x17f   : > { %1278 = vmatmul.mubr.msk.f32.vlgmr.msra.gmra.mxu1 %vm631_vm1, %v1323_v11  ;;  %687 = vadd.xlane.f32.xlu0 %v686_v14 }
 0x180   : > { %1288 = vmatpush3.msra.mxu1 %v273_v45 }
 0x181   : > { %v1327_v16 = vpop.eup %1326  ;;  %1289 = vmatprep.subr.mxu1 %v272_v15 }
 0x182   : > { %v1329_v17 = vpop.eup %1328  ;;  %1291 = vmatprep.mubr.msk.f32.mxu1 %vm631_vm1, %v1327_v16  ;;  %1290 = vmatpush3.msra.mxu1 %v272_v15  ;;  %v698_v21 = vsel %vm631_vm1, %v1327_v16, 0.0 }
 0x183   : > { %1284 = vmatprep.mubr.msk.f32.mxu0 %vm631_vm1, %v1329_v17  ;;  %v692_v18 = vsel %vm631_vm1, %v1329_v17, 0.0 }
 0x184   : > { %693 = vadd.xlane.f32.xlu0 %v692_v18 }
 0x185   : > { %v1331_v19 = vpop.eup %1330 }
 0x186   : > { %v1333_v20 = vpop.eup %1332  ;;  %1292 = vmatmul.mubr.msk.f32.vlgmr.msra.gmra.mxu1 %vm631_vm1, %v1331_v19  ;;  %v701_v23 = vsel %vm631_vm1, %v1331_v19, 0.0 }
 0x187   : > { %1285 = vmatmul.mubr.msk.f32.vlgmr.msra.gmra.mxu0 %vm631_vm1, %v1333_v20  ;;  %v695_v22 = vsel %vm631_vm1, %v1333_v20, 0.0 }
 0x188   : > { %699 = vadd.xlane.f32.xlu0 %v698_v21  ;;  %696 = vadd.xlane.f32.xlu1 %v695_v22 }
 0x18c   : > { %702 = vadd.xlane.f32.xlu1 %v701_v23 }
 0x202   : > { %v685_v24 = vpop.xlane.xlu1 %684 }
 0x203   : > { %1334 = vrcp.f32 %v685_v24 }
 0x204   : > { %v682_v25 = vpop.xlane.xlu0 %681 }
 0x205   : > { %1336 = vrcp.f32 %v682_v25 }
 0x206   : > { %v691_v26 = vpop.xlane.xlu1 %690 }
 0x207   : > { %1338 = vrcp.f32 %v691_v26 }
 0x208   : > { %v688_v27 = vpop.xlane.xlu0 %687 }
 0x209   : > { %1340 = vrcp.f32 %v688_v27 }
 0x20d   : > { %v694_v29 = vpop.xlane.xlu0 %693 }
 0x210   : > { %v1335_v32 = vpop.eup %1334 }
 0x211   : > { %v697_v28 = vpop.xlane.xlu1 %696  ;;  %v700_v31 = vpop.xlane.xlu0 %699 }
 0x212   : > { %v1337_v35 = vpop.eup %1336 }
 0x214   : > { %v1339_v38 = vpop.eup %1338 }
 0x215   : > { %v703_v30 = vpop.xlane.xlu1 %702 }
 0x216   : > { %1342 = vrcp.f32 %v703_v30  ;;  %v1341_v41 = vpop.eup %1340 }
 0x217   : > { %1344 = vrcp.f32 %v697_v28 }
 0x218   : > { %1346 = vrcp.f32 %v700_v31 }
 0x219   : > { %1348 = vrcp.f32 %v694_v29 }
 0x223   : > { %v1343_v44 = vpop.eup %1342 }
 0x224   : > { %v1345_v46 = vpop.eup %1344 }
 0x225   : > { %v1347_v49 = vpop.eup %1346 }
 0x226   : > { %v1349_v52 = vpop.eup %1348 }
 0x23b   : > { %v1272_v33 = vpop.f32.mrf.mxu0 }
 0x23c   : > { %v1037_v34 = vmul.f32 %v1335_v32, %v1272_v33 }
 0x23d   : > { %v776_v36 = vpop.f32.mrf.mxu0 }
 0x23e   : > { %1045 = vst.msk [vmem:[%s1498_s28 + $0x8] sm:$0xff] %vm274_vm0, %v1037_v34  ;;  %v1036_v37 = vmul.f32 %v1337_v35, %v776_v36 }
 0x23f   : > { %v1279_v39 = vpop.f32.mrf.mxu1 }
 0x240   : > { %1044 = vst.msk [vmem:[%s1498_s28] sm:$0xff] %vm274_vm0, %v1036_v37  ;;  %v1039_v40 = vmul.f32 %v1339_v38, %v1279_v39 }
 0x241   : > { %v857_v42 = vpop.f32.mrf.mxu1 }
 0x242   : > { %1047 = vst.msk [vmem:[%s1498_s28 + $0x18] sm:$0xff] %vm274_vm0, %v1039_v40  ;;  %v1038_v43 = vmul.f32 %v1341_v41, %v857_v42 }
 0x244   : > { %1046 = vst.msk [vmem:[%s1498_s28 + $0x10] sm:$0xff] %vm274_vm0, %v1038_v43 }
 0x246   : > { %v1293_v45 = vpop.f32.mrf.mxu1 }
 0x247   : > { %v1286_v47 = vpop.f32.mrf.mxu0  ;;  %v1043_v48 = vmul.f32 %v1343_v44, %v1293_v45 }
 0x248   : > { %v1041_v50 = vmul.f32 %v1345_v46, %v1286_v47  ;;  %v1019_v51 = vpop.f32.mrf.mxu1 }
 0x249   : > { %1051 = vst.msk [vmem:[%s1498_s28 + $0x38] sm:$0xff] %vm274_vm0, %v1043_v48  ;;  %v938_v53 = vpop.f32.mrf.mxu0  ;;  %v1042_v54 = vmul.f32 %v1347_v49, %v1019_v51 }
 0x24a   : > { %1049 = vst.msk [vmem:[%s1498_s28 + $0x28] sm:$0xff] %vm274_vm0, %v1041_v50  ;;  %v1040_v55 = vmul.f32 %v1349_v52, %v938_v53 }
 0x24b   : > { %1050 = vst.msk [vmem:[%s1498_s28 + $0x30] sm:$0xff] %vm274_vm0, %v1042_v54 }
 0x24c   : > { %1048 = vst.msk [vmem:[%s1498_s28 + $0x20] sm:$0xff] %vm274_vm0, %v1040_v55 }
 0x24d PF: > { %s13_s14 = sadd.s32 1, %s1372_s14   ;;  %s1529_s12 = smov %s1368_s13 }
 0x24e   : > { %p10_p5 = scmp.ge.s32.totalorder %s13_s14, 4   ;;  %s1530_s13 = smov %s1532_s15 }
 0x250   :  { %12 = sbr.rel (!%p10_p5) target bundleno = 2 (0x2), region = 68 }

</bundles_post_ra>
